<compile_context>
chip_gen: v6e
topology: v6e:2x2x1
jax: 0.10.0
libtpu: 0.0.40
codegen_flags: <defaults>
</compile_context>

<pallas_src>
import functools

import jax
import jax.numpy as jnp
from jax.experimental import pallas as pl
from jax.experimental.pallas import tpu as pltpu


def _fold_weight(w: int, dtype) -> jax.Array:
    """(3W, 4W) weight folding the H blend, W blend and even/odd interleave."""
    j = jnp.arange(w)
    # 1-D bilinear x2 matrix a: (2W, W), half-pixel centers, edge clamped
    # (matches PyTorch align_corners=False for scale factor 2).
    a = jnp.zeros((2 * w, w), jnp.float32)
    a = a.at[2 * j, j].add(0.75)
    a = a.at[2 * j, jnp.maximum(j - 1, 0)].add(0.25)
    a = a.at[2 * j + 1, j].add(0.75)
    a = a.at[2 * j + 1, jnp.minimum(j + 1, w - 1)].add(0.25)
    at = a.T                                     # (W, 2W)

    # rows [x[i-1] | x[i] | x[i+1]]  ->  cols [out image row 2i | out row 2i+1]
    m = jnp.zeros((3 * w, 4 * w), jnp.float32)
    m = m.at[0 * w:1 * w, 0:2 * w].set(0.25 * at)       # x[i-1] -> even row
    m = m.at[1 * w:2 * w, 0:2 * w].set(0.75 * at)       # x[i]   -> even row
    m = m.at[1 * w:2 * w, 2 * w:4 * w].set(0.75 * at)   # x[i]   -> odd row
    m = m.at[2 * w:3 * w, 2 * w:4 * w].set(0.25 * at)   # x[i+1] -> odd row
    return m.astype(dtype)                               # 0.25/0.75 products exact in bf16/f32


def _bilinear_x2_kernel(x_ref, w_ref, o_ref, *, precision):
    # x_ref: (BC, H, W)   w_ref: (3W, 4W)   o_ref: (BC, H, 4W)
    x = x_ref[...]
    bc, h, w = x.shape

    # Edge-clamped neighbor rows (rows live on sublanes; cheap slice+concat).
    if h > 1:
        xu = jnp.concatenate([x[:, :1, :], x[:, :-1, :]], axis=1)   # x[i-1]
        xd = jnp.concatenate([x[:, 1:, :], x[:, -1:, :]], axis=1)   # x[i+1]
    else:
        xu = x
        xd = x

    # Pack [x[i-1] | x[i] | x[i+1]] along lanes; a single MXU matmul performs
    # the H blend, the W blend and the even/odd interleave, emitting output
    # image rows 2i and 2i+1 contiguously (lane-dense, unmasked stores).
    t = jnp.concatenate([xu, x, xd], axis=-1).reshape(bc * h, 3 * w)
    out = jnp.dot(t, w_ref[...], preferred_element_type=jnp.float32,
                  precision=precision)
    o_ref[...] = out.reshape(bc, h, 4 * w).astype(o_ref.dtype)


def _pick_block_channels(nc: int, h: int, w: int, itemsize: int) -> int:
    """Channels per grid step, sized against a conservative VMEM budget."""
    rup = lambda v, m: -(-v // m) * m
    h_p = rup(h, 8)
    in_row, mid_row, out_row = rup(w, 128), rup(3 * w, 128), rup(4 * w, 128)
    # Double-buffered in/out tiles + intermediates (xu, xd, packed t, f32 acc).
    per_c = h_p * (2 * (in_row + out_row) * itemsize
                   + (2 * in_row + mid_row) * itemsize
                   + out_row * 4)
    budget = 20 * 1024 * 1024          # stays inside 32 MiB scoped VMEM on v5e/v6e/v7x
    bc = max(1, min(nc, budget // max(per_c, 1)))
    if nc >= 2:                        # keep >= 2 grid steps (v7x has 2 TensorCores)
        bc = min(bc, -(-nc // 2))
    return int(bc)


def trivial_upsample(x, *, block_channels=None):
    """x: (N, C, H, W) -> (N, C, 2H, 2W), bilinear, align_corners=False."""
    n, c, h, w = x.shape
    nc = n * c
    xf = x.reshape(nc, h, w)
    wfold = _fold_weight(w, x.dtype)

    bc = block_channels or _pick_block_channels(nc, h, w, x.dtype.itemsize)
    precision = jax.lax.Precision.HIGHEST if x.dtype == jnp.float32 else None

    out = pl.pallas_call(
        functools.partial(_bilinear_x2_kernel, precision=precision),
        out_shape=jax.ShapeDtypeStruct((nc, h, 4 * w), x.dtype),
        grid_spec=pltpu.PrefetchScalarGridSpec(
            num_scalar_prefetch=0,
            grid=(pl.cdiv(nc, bc),),
            in_specs=[
                pl.BlockSpec((bc, h, w), lambda i: (i, 0, 0)),
                pl.BlockSpec((3 * w, 4 * w), lambda i: (0, 0)),  # resident weight
            ],
            out_specs=pl.BlockSpec((bc, h, 4 * w), lambda i: (i, 0, 0)),
        ),
        compiler_params=pltpu.CompilerParams(
            dimension_semantics=("parallel",),
            vmem_limit_bytes=32 * 1024 * 1024,
        ),
    )(xf, wfold)

    # (NC, H, 4W) is bit-identical (row-major) to (NC, 2H, 2W): free reshape.
    return out.reshape(n, c, 2 * h, 2 * w)


if __name__ == "__main__":
    key = jax.random.PRNGKey(0)
    N, C, H, W = 2, 4, 16, 16
    x = jax.random.normal(key, (N, C, H, W), dtype=jnp.float32)

    y = trivial_upsample(x)
    jax.block_until_ready(y)

    assert y.shape == (N, C, 2 * H, 2 * W)
    assert y.dtype == x.dtype

    # Independent reference: jax.image.resize bilinear (half-pixel centers)
    # matches PyTorch F.interpolate(scale_factor=2, mode='bilinear',
    # align_corners=False). With Precision.HIGHEST the kernel agrees to ~1e-6;
    # 1e-3 leaves margin for MXU multi-pass rounding while still catching any
    # structural bug (wrong weights / interleave / edge clamp are O(0.1-1)).
    ref = jax.image.resize(x, (N, C, 2 * H, 2 * W), method="bilinear")
    err = float(jnp.max(jnp.abs(y - ref)))
    if not jnp.allclose(y, ref, atol=1e-3, rtol=1e-3):
        raise AssertionError(f"Pallas upsample mismatch (max abs err {err})")

    print("KERNEL_OK")
</pallas_src>

<mosaic_0001>
module attributes {stable_mosaic.version = 11 : i64} {
  func.func @_bilinear_x2_kernel(%arg0: i32, %arg1: memref<4x16x16xf32, #tpu.memory_space<vmem>>, %arg2: memref<48x64xf32, #tpu.memory_space<vmem>>, %arg3: memref<4x16x64xf32, #tpu.memory_space<vmem>>) attributes {dimension_semantics = [#tpu.dimension_semantics<parallel>], iteration_bounds = array<i64: 2>, scalar_prefetch = 0 : i64, scratch_operands = 0 : i64, tpu.core_type = #tpu.core_type<tc>, window_params = [{transform_indices = @transform_0, window_bounds = array<i64: 4, 16, 16>}, {pipeline_mode = #tpu.pipeline_mode<synchronous>, transform_indices = @transform_1, window_bounds = array<i64: 48, 64>}, {transform_indices = @transform_2, window_bounds = array<i64: 4, 16, 64>}]} {
    %c0 = arith.constant 0 : index
    %c0_0 = arith.constant 0 : index
    %c0_1 = arith.constant 0 : index
    %0 = vector.load %arg1[%c0, %c0_0, %c0_1] : memref<4x16x16xf32, #tpu.memory_space<vmem>>, vector<4x16x16xf32>
    %1 = vector.extract_strided_slice %0 {offsets = [0, 0, 0], sizes = [4, 1, 16], strides = [1, 1, 1]} : vector<4x16x16xf32> to vector<4x1x16xf32>
    %2 = vector.extract_strided_slice %0 {offsets = [0, 0, 0], sizes = [4, 15, 16], strides = [1, 1, 1]} : vector<4x16x16xf32> to vector<4x15x16xf32>
    %3 = tpu.concatenate %1, %2 in 1 : vector<4x1x16xf32>, vector<4x15x16xf32> -> vector<4x16x16xf32>
    %4 = vector.extract_strided_slice %0 {offsets = [0, 1, 0], sizes = [4, 15, 16], strides = [1, 1, 1]} : vector<4x16x16xf32> to vector<4x15x16xf32>
    %5 = vector.extract_strided_slice %0 {offsets = [0, 15, 0], sizes = [4, 1, 16], strides = [1, 1, 1]} : vector<4x16x16xf32> to vector<4x1x16xf32>
    %6 = tpu.concatenate %4, %5 in 1 : vector<4x15x16xf32>, vector<4x1x16xf32> -> vector<4x16x16xf32>
    %7 = tpu.concatenate %3, %0, %6 in 2 : vector<4x16x16xf32>, vector<4x16x16xf32>, vector<4x16x16xf32> -> vector<4x16x48xf32>
    %8 = vector.shape_cast %7 : vector<4x16x48xf32> to vector<64x48xf32>
    %c0_2 = arith.constant 0 : index
    %c0_3 = arith.constant 0 : index
    %9 = vector.load %arg2[%c0_2, %c0_3] : memref<48x64xf32, #tpu.memory_space<vmem>>, vector<48x64xf32>
    %cst = arith.constant dense<0.000000e+00> : vector<64x64xf32>
    %10 = tpu.matmul %8, %9, %cst {dimension_numbers = #tpu.dot_dimension_numbers<[1], [0], [0], [1], [0, 0, 1, 1], [], []>, precision = #tpu.contract_precision<fp32>} : vector<64x48xf32>, vector<48x64xf32>, vector<64x64xf32> -> vector<64x64xf32>
    %11 = vector.shape_cast %10 : vector<64x64xf32> to vector<4x16x64xf32>
    %c0_4 = arith.constant 0 : index
    %c0_5 = arith.constant 0 : index
    %c0_6 = arith.constant 0 : index
    %12 = vector.load %arg3[%c0_4, %c0_5, %c0_6] : memref<4x16x64xf32, #tpu.memory_space<vmem>>, vector<4x16x64xf32>
    tpu.vector_store %arg3[%c0_4, %c0_5, %c0_6], %11 {strides = array<i32>} : memref<4x16x64xf32, #tpu.memory_space<vmem>>, vector<4x16x64xf32>,
    return
  }
  func.func @transform_0(%arg0: i32) -> (i32, i32, i32) {
    %c0_i32 = arith.constant 0 : i32
    %c0_i32_0 = arith.constant 0 : i32
    %c0_i32_1 = arith.constant 0 : i32
    return %arg0, %c0_i32, %c0_i32_0 : i32, i32, i32
  }
  func.func @transform_1(%arg0: i32) -> (i32, i32) {
    %c0_i32 = arith.constant 0 : i32
    %c0_i32_0 = arith.constant 0 : i32
    %c0_i32_1 = arith.constant 0 : i32
    return %c0_i32, %c0_i32_0 : i32, i32
  }
  func.func @transform_2(%arg0: i32) -> (i32, i32, i32) {
    %c0_i32 = arith.constant 0 : i32
    %c0_i32_0 = arith.constant 0 : i32
    %c0_i32_1 = arith.constant 0 : i32
    return %arg0, %c0_i32, %c0_i32_0 : i32, i32, i32
  }
}

</mosaic_0001>

<bundles_post_ra>
// kernel: tpu_custom_call.1
= control target key start
LH: loop header
LB: loop body
LE: loop exit
PB: predicated region body
PF: predicated region fallthrough
CT: control target
= control target key end

     0   :  { %7 = vsyncpa [#allocation3], 0  ;;  %s2267_s0 = inlined_call_operand.hbm [shape: f32[8,16,16], index: 0, kind: input, shape index: {}]   ;;  %s2268_s1 = inlined_call_operand.hbm [shape: f32[48,64], index: 1, kind: input, shape index: {}]   ;;  %s2269_s2 = inlined_call_operand.hbm [shape: f32[8,16,64], index: 2, kind: output, shape index: {}]  }
   0x1   :  { %9 = vsyncpa [#allocation3 + $0x1], 0 }
   0x2   :  { %10 = vsyncpa [#allocation6], 0 }
   0x3   :  { %11 = vsyncpa [#allocation4], 0 }
   0x4   :  { %13 = vsyncpa [#allocation4 + $0x1], 0  ;;  %s1723_s9 = smov 0   ;;  %s1725_s10 = smov 0  }
   0x5   :  { %s1727_s11 = smov 0   ;;  %s1729_s12 = smov 0  }
   0x6 LB: > { %s1744_s13 = sadd.s32 4294967295, %s1697_s12   ;;  %s1262_s14 = sadd.s32 4294967294, %s1697_s12   ;;  %s1697_s12 = sphi %s1729_s12, %s2291_s12   ;;  %s1693_s11 = sphi %s1727_s11, %s2290_s11   ;;  %s1689_s10 = sphi %s1725_s10, %s2289_s10   ;;  %s1685_s9 = sphi %s1723_s9, %s2288_s9  }
   0x7   : > { %p39_p0 = scmp.ne.s32.totalorder %s1689_s10, %s1685_s9  ;;  %p2270_p1 = scmp.eq.s32.totalorder %s1744_s13, 0 }
   0x8   : > { %p90_p3 = scmp.eq.s32.totalorder %s1262_s14, 1  ;;  %p1263_p5 = scmp.ge.s32.totalorder %s1697_s12, 1 }
   0x9   : > { %p1753_p4 = por %p2270_p1, %p39_p0  ;;  %p97_p7 = scmp.lt.s32.totalorder %s1697_s12, 3 }
   0xa   : > { %p1758_p6 = por %p90_p3, %p39_p0  ;;  %s1699_s18 = smov [#allocation5]  }
   0xb   : > { %s2274_s15 = scalar_select %p1753_p4, 1, 0 }
   0xc   : > { %s2275_s16 = scalar_select %p1758_p6, 1, 0 }
   0xd   : > { %p1763_p8 = pnand %p1263_p5, %p97_p7  ;;  %s109_s19 = sshll.u32 %s1699_s18, 4  ;;  %s110_s19 = int_to_ptr.vmem [resolvable:$true] %s109_s19 }
   0xe   : > { %s1777_s21 = sadd.s32 1, %s1697_s12   ;;  %s26_s22 = sadd.s32 1, %s1693_s11 }
   0xf   : > { %s2276_s17 = scalar_select %p1763_p8, 1, 0 }
  0x10   : > { %p1520_p9 = pneg %p1763_p8  ;;  %s23_s23 = ssub.s32 %s1697_s12, %s1777_s21 }
  0x11   : > { %s1586_s24 = scalar_lea.vmem %s110_s19, 768  ;;  %p1594_p5 = scmp.lt.s32.totalorder %s110_s19, %s110_s19 }
  0x12   : > { %p1772_p11 = pnand %p1520_p9, %p2270_p1  ;;  %p1587_p13 = scmp.ne.s32.totalorder %s110_s19, %s1586_s24 }
  0x13   : > { %p1595_p7 = scmp.lt.s32.totalorder %s1586_s24, %s1586_s24 }
  0x14   : > { %p1577_p12 = pneg %p1772_p11 }
  0x15   : > { %p1596_p10 = por %p1595_p7, %p1594_p5 }
  0x16   : > { %p1589_p0 = pnand %p1587_p13, %p1577_p12 }
  0x18   : > { %p1590_p3 = pneg %p1589_p0 }
  0x1a   : > { %p1597_p2 = pnand %p1596_p10, %p1590_p3 }
  0x1c   : > { %1600 = shalt.err (!%p1597_p2)
}
  0x1d   : > { %s1700_s25 = smov 128   ;;  %s1701_s26 = smov 8  }
  0x1e   : > { %1523 = dma.hbm_to_vmem [thread:$0]  (!%p1772_p11), %s2268_s1, 768, %s110_s19, [#allocation6], %s1700_s25, %s1700_s25, %s1701_s26  }
  0x1f   : > { %p24_p2 = scmp.eq.s32.totalorder %s23_s23, 0  ;;  %p33_p9 = scmp.ne.s32.totalorder %s1693_s11, %s1689_s10 }
  0x20   : > { %p34_p10 = scmp.eq.s32.totalorder %s1697_s12, 0  ;;  %p1533_p12 = scmp.lt.s32.totalorder %s1697_s12, 2 }
  0x21   : > { %s1797_s29 = scalar_select %p24_p2, %s1693_s11, %s26_s22  }
  0x22   : > { %p35_p13 = por %p34_p10, %p33_p9  ;;  %p2278_p0 = scmp.eq.s32.totalorder %s1744_s13, 1 }
  0x23   : > { %s123_s3 = sand.u32 1, %s1693_s11   ;;  %s1281_s4 = sshll.u32 %s1697_s12, 10 }
  0x24   : > { %p1801_p3 = por %p2278_p0, %p33_p9  ;;  %s1266_s5 = sshll.u32 %s123_s3, 6 }
  0x25   : > { %s1810_s8 = scalar_lea.hbm %s2267_s0, %s1281_s4  ;;  %s127_s14 = scalar_lea.vmem [#allocation2], %s1266_s5 }
  0x26   : > { %s2279_s30 = scalar_select %p1801_p3, 1, 0 }
  0x27   : > { %s135_s18 = sshll.u32 %s127_s14, 4  ;;  %p1812_p11 = pnand %p1533_p12, %p35_p13  ;;  %s1816_s18 = int_to_ptr.vmem [resolvable:$true] %s135_s18 }
  0x28   : > { %s1818_s20 = scalar_lea.sflag [#allocation3], %s123_s3  ;;  %s1601_s22 = scalar_lea.hbm %s1810_s8, 1024 }
  0x29   : > { %p1602_p5 = scmp.ne.s32.totalorder %s1810_s8, %s1601_s22  ;;  %p1603_p7 = pneg %p1812_p11 }
  0x2a   : > { %s1606_s27 = scalar_lea.hbm %s2267_s0, 2048  ;;  %p1607_p10 = scmp.lt.s32.totalorder %s1810_s8, %s2267_s0 }
  0x2b   : > { %p1604_p2 = pnand %p1603_p7, %p1602_p5  ;;  %p1608_p12 = scmp.lt.s32.totalorder %s1606_s27, %s1601_s22 }
  0x2d   : > { %p1605_p9 = pneg %p1604_p2  ;;  %p1609_p13 = por %p1608_p12, %p1607_p10 }
  0x2f   : > { %p1610_p0 = pnand %p1609_p13, %p1605_p9 }
  0x31   : > { %1613 = shalt.err (!%p1610_p0)
}
  0x32   : > { %s1614_s3 = scalar_lea.vmem %s1816_s18, 1024  ;;  %s1702_s5 = smov [#allocation2]  }
  0x33   : > { %p1615_p1 = scmp.ne.s32.totalorder %s1816_s18, %s1614_s3  ;;  %s1619_s6 = sshll.u32 %s1702_s5, 4  ;;  %s1620_s6 = int_to_ptr.vmem [resolvable:$false] %s1619_s6 }
  0x34   : > { %s1621_s7 = scalar_lea.vmem %s1620_s6, 2048  ;;  %p1622_p2 = scmp.lt.s32.totalorder %s1816_s18, %s1620_s6 }
  0x35   : > { %p1617_p6 = pnand %p1615_p1, %p1603_p7  ;;  %p1623_p3 = scmp.lt.s32.totalorder %s1621_s7, %s1614_s3 }
  0x37   : > { %p1618_p5 = pneg %p1617_p6  ;;  %p1624_p4 = por %p1623_p3, %p1622_p2 }
  0x39   : > { %p1625_p8 = pnand %p1624_p4, %p1618_p5 }
  0x3b   : > { %1628 = shalt.err (!%p1625_p8)
}
  0x3c   : > { %1527 = dma.hbm_to_vmem [thread:$0]  (!%p1812_p11), %s1810_s8, 1024, %s1816_s18, %s1818_s20, %s1700_s25, %s1700_s25, %s1701_s26  }
  0x3d   : > { %p2281_p1 = scmp.ne.s32.totalorder %s2276_s17, 0 }
  0x3e   : > { %s1845_s14 = sand.u32 (!%p2281_p1), 1, %s1689_s10   ;;  %p2282_p4 = scmp.ne.s32.totalorder (!%p2281_p1), %s2274_s15, 0 }
  0x3f   : > { %147 = sbr.rel (%p2281_p1) target bundleno = 476 (0x1dc), region = 28  ;;  %s1271_s22 = sshll.u32 (!%p2281_p1), %s1845_s14, 6 }
  0x40   : > { %s150_s23 = scalar_lea.sflag (!%p2281_p1), [#allocation3], %s1845_s14  ;;  %s1851_s19 = scalar_lea.vmem (!%p2281_p1), [#allocation2], %s1271_s22 }
  0x44   : > { %1672 = dma.done.wait (%p2282_p4), %s150_s23, 1024  }
  0x45   : > { %1674 = vsyncadd (%p2282_p4), %s150_s23, 4294966272  ;;  %p2283_p6 = scmp.eq.s32.totalorder %s1744_s13, 0 }
  0x47   : > { %1676 = dma.done.wait (%p2283_p6), [#allocation6], 768   ;;  %p2284_p8 = pmov %p2283_p6 }
  0x48   : > { %v183_v0 = vld [vmem:[%s1851_s19 + $0x18] sm:$0xff]  ;;  %v1863_v1 = vld [vmem:[%s1851_s19] sm:$0xff]  ;;  %v181_v2 = vld [vmem:[%s1851_s19 + $0x8] sm:$0xff]  ;;  %s1703_s17 = smov 16   ;;  %vm221_vm0 = vcmask 1046528   ;;  %vm196_vm1 = vcmask 1040384  }
  0x49   : > { %1678 = vsyncadd (%p2284_p8), [#allocation6], 4294966528  ;;  %248 = vrot.lane.b32.xlu1 %v183_v0, %s1703_s17  ;;  %242 = vrot.lane.b32.xlu0 %v1863_v1, %s1703_s17  ;;  %v222_v3 = vrot.slane %v1863_v1, 1  ;;  %v1871_v4 = vld [vmem:[%s1851_s19 + $0x10] sm:$0xff]  ;;  %v201_v5 = vrot.slane %v183_v0, 7  ;;  %v223_v6 = vrot.slane %v181_v2, 1 }
  0x4a   : > { %v200_v7 = vrot.slane %v1871_v4, 7  ;;  %v198_v8 = vrot.slane %v181_v2, 7  ;;  %v317_v10 = vld [vmem:[#allocation5 + $0x28] sm:$0xff]  ;;  %v316_v11 = vld [vmem:[#allocation5 + $0x20] sm:$0xff]  ;;  %v315_v12 = vld [vmem:[#allocation5 + $0x18] sm:$0xff]  ;;  %v197_v13 = vrot.slane %v1863_v1, 7 }
  0x4b   : > { %v224_v9 = vsel %vm221_vm0, %v222_v3, %v223_v6  ;;  %s1704_s15 = smov 32   ;;  %v225_v14 = vrot.slane %v1871_v4, 1  ;;  %v226_v15 = vrot.slane %v183_v0, 1  ;;  %v1880_v16 = vld [vmem:[%s1851_s19 + $0x20] sm:$0xff]  ;;  %v185_v17 = vld [vmem:[%s1851_s19 + $0x28] sm:$0xff]  ;;  %v314_v18 = vld [vmem:[#allocation5 + $0x10] sm:$0xff]  ;;  %v238_v19 = vsel %vm221_vm0, %v223_v6, %v181_v2 }
  0x4c   : > { %v203_v20 = vrot.slane %v1880_v16, 7  ;;  %v204_v21 = vrot.slane %v185_v17, 7  ;;  %v1888_v22 = vsel %vm196_vm1, %v200_v7, %v201_v5  ;;  %v313_v23 = vld [vmem:[#allocation5 + $0x8] sm:$0xff]  ;;  %v1891_v24 = vld [vmem:[%s1851_s19 + $0x30] sm:$0xff]  ;;  %v1894_v25 = vld [vmem:[%s1851_s19 + $0x38] sm:$0xff]  ;;  %v1896_v26 = vand.u32 4294901760, %v317_v10 }
  0x4d   : > { %244 = vrot.lane.b32.xlu0 %v181_v2, %s1703_s17  ;;  %270 = vrot.lane.b32.xlu1 %v224_v9, %s1704_s15  ;;  %v1898_v27 = vand.u32 4294901760, %v316_v11  ;;  %v1903_v28 = vsel %vm196_vm1, %v197_v13, %v198_v8  ;;  %v1905_v29 = vand.u32 4294901760, %v315_v12  ;;  %v206_v30 = vrot.slane %v1891_v24, 7  ;;  %v312_v33 = vld [vmem:[#allocation5] sm:$0xff]  ;;  %s2199_s25 = scalar_lea.vmem [#allocation7], %s1271_s22  ;;  %s1283_s26 = sshll.u32 %s1744_s13, 10 }
  0x4e   : > { %v207_v31 = vrot.slane %v1894_v25, 7  ;;  %v1909_v32 = vand.u32 4294901760, %v314_v18  ;;  %v1915_v34 = vsub.f32 %v317_v10, %v1896_v26  ;;  %v1923_v37 = vand.u32 4294901760, %v313_v23  ;;  %1368 = vmatprep.subr.mxu0 %v1896_v26  ;;  %s1179_s8 = sshll.u32 %s2199_s25, 4  ;;  %s2218_s24 = scalar_lea.hbm %s2269_s2, %s1283_s26  ;;  %s2220_s8 = int_to_ptr.vmem [resolvable:$true] %s1179_s8 }
  0x4f   : > { %v1918_v35 = vsub.f32 %v316_v11, %v1898_v27  ;;  %v1921_v36 = vsub.f32 %v315_v12, %v1905_v29  ;;  %v227_v38 = vsel %vm221_vm0, %v225_v14, %v226_v15  ;;  %v239_v39 = vsel %vm221_vm0, %v226_v15, %v183_v0  ;;  %1369 = vmatpush3.msra.mxu0 %v1896_v26  ;;  %s1165_s13 = scalar_lea.sflag [#allocation4], %s1845_s14  ;;  %s1629_s27 = scalar_lea.vmem %s2220_s8, 1024 }
  0x50   : > { %v1928_v40 = vsub.f32 %v314_v18, %v1909_v32  ;;  %v1934_v41 = vsel %vm196_vm1, %v203_v20, %v204_v21  ;;  %v1937_v42 = vand.u32 4294901760, %v1915_v34  ;;  %v1946_v45 = vand.u32 4294901760, %v312_v33  ;;  %1370 = vmatprep.subr.mxu0 %v1898_v27  ;;  %p1630_p3 = scmp.ne.s32.totalorder %s2220_s8, %s1629_s27  ;;  %p2285_p11 = scmp.ne.s32.totalorder %s2279_s30, 0 }
  0x51   : > { %246 = vrot.lane.b32.xlu0 %v1871_v4, %s1703_s17  ;;  %272 = vrot.lane.b32.xlu1 %v238_v19, %s1704_s15  ;;  %v1940_v43 = vand.u32 4294901760, %v1918_v35  ;;  %v1943_v44 = vand.u32 4294901760, %v1921_v36  ;;  %v1949_v46 = vsub.f32 %v313_v23, %v1923_v37  ;;  %v1955_v47 = vsel %vm196_vm1, %v206_v30, %v207_v31  ;;  %s1705_s28 = smov [#allocation7]  }
  0x52   : > { %v518_v48 = vsub.f32 %v1915_v34, %v1937_v42  ;;  %v228_v50 = vrot.slane %v1880_v16, 1  ;;  %v229_v51 = vrot.slane %v185_v17, 1  ;;  %v1965_v52 = vand.u32 4294901760, %v1928_v40  ;;  %1371 = vmatpush3.msra.mxu0 %v1898_v27  ;;  %p1631_p7 = pnand %p1630_p3, %p2285_p11  ;;  %s1633_s4 = sshll.u32 %s1705_s28, 4  ;;  %s1634_s4 = int_to_ptr.vmem [resolvable:$false] %s1633_s4 }
  0x53   : > { %v525_v49 = vsub.f32 %v1918_v35, %v1940_v43  ;;  %v532_v54 = vsub.f32 %v1921_v36, %v1943_v44  ;;  %v1971_v55 = vsub.f32 %v312_v33, %v1946_v45  ;;  %1372 = vmatprep.subr.mxu0 %v1905_v29  ;;  %v1975_v57 = vand.u32 4294901760, %v1949_v46  ;;  %s1635_s3 = scalar_lea.vmem %s1634_s4, 2048  ;;  %p1636_p10 = scmp.lt.s32.totalorder %s2220_s8, %s1634_s4 }
  0x54   : > { %v519_v53 = vand.u32 4294901760, %v518_v48  ;;  %1373 = vmatpush3.msra.mxu0 %v1905_v29  ;;  %v230_v58 = vsel %vm221_vm0, %v228_v50, %v229_v51  ;;  %v240_v59 = vsel %vm221_vm0, %v229_v51, %v185_v17  ;;  %v539_v60 = vsub.f32 %v1928_v40, %v1965_v52  ;;  %p1632_p9 = pneg %p1631_p7  ;;  %p1637_p12 = scmp.lt.s32.totalorder %s1635_s3, %s1629_s27 }
  0x55   : > { %274 = vrot.lane.b32.xlu0 %v227_v38, %s1704_s15  ;;  %276 = vrot.lane.b32.xlu1 %v239_v39, %s1704_s15  ;;  %v526_v56 = vand.u32 4294901760, %v525_v49  ;;  %v533_v61 = vand.u32 4294901760, %v532_v54  ;;  %v1987_v62 = vand.u32 4294901760, %v1971_v55  ;;  %v546_v63 = vsub.f32 %v1949_v46, %v1975_v57 }
  0x56   : > { %1392 = vmatprep.subr.mxu1 %v519_v53  ;;  %1374 = vmatprep.subr.mxu0 %v1909_v32  ;;  %v231_v0 = vrot.slane %v1891_v24, 1  ;;  %v232_v2 = vrot.slane %v1894_v25, 1  ;;  %v540_v3 = vand.u32 4294901760, %v539_v60  ;;  %vm294_vm2 = vcmask 130048   ;;  %p1638_p13 = por %p1637_p12, %p1636_p10 }
  0x57   : > { %1393 = vmatpush3.msra.mxu1 %v519_v53  ;;  %1375 = vmatpush3.msra.mxu0 %v1909_v32  ;;  %v553_v5 = vsub.f32 %v1971_v55, %v1987_v62  ;;  %v547_v6 = vand.u32 4294901760, %v546_v63  ;;  %v217_v14 = vsel %vm196_vm1, %v1863_v1, %v197_v13  ;;  %vm303_vm3 = vcmask 261120  }
  0x58   : > { %1394 = vmatprep.subr.mxu1 %v526_v56  ;;  %1376 = vmatprep.subr.mxu0 %v1923_v37  ;;  %v233_v8 = vsel %vm221_vm0, %v231_v0, %v232_v2  ;;  %v241_v9 = vsel %vm221_vm0, %v232_v2, %v1894_v25  ;;  %vm318_vm4 = vcmask 392192   ;;  %v218_v1 = vsel %vm196_vm1, %v1871_v4, %v200_v7  ;;  %p1639_p0 = pnand %p1638_p13, %p1632_p9 }
  0x59   : > { %250 = vrot.lane.b32.xlu0 %v1880_v16, %s1703_s17  ;;  %252 = vrot.lane.b32.xlu1 %v185_v17, %s1703_s17  ;;  %v554_v10 = vand.u32 4294901760, %v553_v5  ;;  %vm1155_vm5 = vcmask 523264  }
  0x5a   : > { %1395 = vmatpush3.msra.mxu1 %v526_v56  ;;  %1377 = vmatpush3.msra.mxu0 %v1923_v37 }
  0x5b   : > { %1396 = vmatprep.subr.mxu1 %v533_v61  ;;  %1378 = vmatprep.subr.mxu0 %v1946_v45 }
  0x5c   : > { %1397 = vmatpush3.msra.mxu1 %v533_v61  ;;  %1379 = vmatpush3.msra.mxu0 %v1946_v45 }
  0x5d   : > { %278 = vrot.lane.b32.xlu0 %v230_v58, %s1704_s15  ;;  %280 = vrot.lane.b32.xlu1 %v240_v59, %s1704_s15 }
  0x5e   : > { %1398 = vmatprep.subr.mxu1 %v540_v3  ;;  %1416 = vmatprep.subr.mxu0 %v1915_v34 }
  0x5f   : > { %1399 = vmatpush3.msra.mxu1 %v540_v3 }
  0x60   : > { %1400 = vmatprep.subr.mxu1 %v547_v6 }
  0x61   : > { %254 = vrot.lane.b32.xlu0 %v1891_v24, %s1703_s17  ;;  %256 = vrot.lane.b32.xlu1 %v1894_v25, %s1703_s17 }
  0x62   : > { %1401 = vmatpush3.msra.mxu1 %v547_v6  ;;  %v219_v6 = vsel %vm196_vm1, %v1880_v16, %v203_v20 }
  0x63   : > { %1402 = vmatprep.subr.mxu1 %v554_v10 }
  0x64   : > { %1403 = vmatpush3.msra.mxu1 %v554_v10 }
  0x65   : > { %282 = vrot.lane.b32.xlu0 %v233_v8, %s1704_s15  ;;  %284 = vrot.lane.b32.xlu1 %v241_v9, %s1704_s15 }
  0x66   : > { %1440 = vmatprep.subr.mxu1 %v1896_v26 }
  0xbb   : > { %v249_v11 = vpop.permute.xlu1 %248  ;;  %v243_v12 = vpop.permute.xlu0 %242 }
  0xbc   : > { %v295_v15 = vsel %vm294_vm2, %v217_v14, %v243_v12  ;;  %v298_v49 = vsel %vm294_vm2, %v1888_v22, %v249_v11 }
  0xbf   : > { %v245_v17 = vpop.permute.xlu0 %244  ;;  %v271_v18 = vpop.permute.xlu1 %270 }
  0xc0   : > { %v304_v19 = vsel %vm303_vm3, %v295_v15, %v271_v18  ;;  %v296_v25 = vsel %vm294_vm2, %v1903_v28, %v245_v17 }
  0xc1   : > { %v320_v21 = vsel %vm318_vm4, %v304_v19, 0 }
  0xc2   : > { %v2020_v23 = vand.u32 4294901760, %v320_v21 }
  0xc3   : > { %v247_v31 = vpop.permute.xlu0 %246  ;;  %v273_v33 = vpop.permute.xlu1 %272 }
  0xc4   : > { %v2025_v38 = vsub.f32 %v320_v21, %v2020_v23  ;;  %v305_v13 = vsel %vm303_vm3, %v296_v25, %v273_v33  ;;  %1404 = vmatprep.mubr.f32.mxu1 %v2020_v23  ;;  %v297_v50 = vsel %vm294_vm2, %v218_v1, %v247_v31 }
  0xc5   : > { %v323_v39 = vsel %vm318_vm4, %v305_v13, 0 }
  0xc6   : > { %v2034_v48 = vand.u32 4294901760, %v323_v39  ;;  %v416_v28 = vand.u32 4294901760, %v2025_v38 }
  0xc7   : > { %v275_v51 = vpop.permute.xlu0 %274  ;;  %v277_v53 = vpop.permute.xlu1 %276 }
  0xc8   : > { %v2041_v54 = vsub.f32 %v323_v39, %v2034_v48  ;;  %v306_v4 = vsel %vm303_vm3, %v297_v50, %v275_v51  ;;  %v307_v7 = vsel %vm303_vm3, %v298_v49, %v277_v53  ;;  %1405 = vmatmul.mubr.f32.vlgmr.msra.gmra.mxu1 %v2034_v48  ;;  %v417_v56 = vsub.f32 %v2025_v38, %v416_v28 }
  0xc9   : > { %v326_v58 = vsel %vm318_vm4, %v306_v4, 0  ;;  %v329_v22 = vsel %vm318_vm4, %v307_v7, 0  ;;  %1441 = vmatpush3.msra.mxu1 %v1896_v26  ;;  %v220_v51 = vsel %vm196_vm1, %v1891_v24, %v206_v30 }
  0xca   : > { %v2052_v59 = vand.u32 4294901760, %v326_v58  ;;  %v2054_v60 = vand.u32 4294901760, %v329_v22  ;;  %v418_v61 = vand.u32 4294901760, %v417_v56  ;;  %v426_v63 = vand.u32 4294901760, %v2041_v54  ;;  %1442 = vmatprep.subr.mxu1 %v1898_v27 }
  0xcb   : > { %v251_v0 = vpop.permute.xlu0 %250  ;;  %v253_v2 = vpop.permute.xlu1 %252  ;;  %1443 = vmatpush3.msra.mxu1 %v1898_v27 }
  0xcc   : > { %v2060_v3 = vsub.f32 %v326_v58, %v2052_v59  ;;  %v2063_v5 = vsub.f32 %v329_v22, %v2054_v60  ;;  %1380 = vmatprep.mubr.f32.mxu0 %v418_v61  ;;  %1407 = vmatprep.mubr.f32.mxu1 %v2052_v59  ;;  %v427_v8 = vsub.f32 %v2041_v54, %v426_v63 }
  0xcd   : > { %1444 = vmatprep.subr.mxu1 %v1905_v29  ;;  %1408 = vmatmul.mubr.f32.gmra.mxu1 %v2054_v60  ;;  %v299_v11 = vsel %vm294_vm2, %v219_v6, %v251_v0  ;;  %v300_v16 = vsel %vm294_vm2, %v1934_v41, %v253_v2 }
  0xce   : > { %v436_v9 = vand.u32 4294901760, %v2060_v3  ;;  %v446_v10 = vand.u32 4294901760, %v2063_v5  ;;  %v428_v14 = vand.u32 4294901760, %v427_v8  ;;  %1445 = vmatpush3.msra.mxu1 %v1905_v29 }
  0xcf   : > { %v279_v20 = vpop.permute.xlu0 %278  ;;  %v281_v12 = vpop.permute.xlu1 %280  ;;  %1446 = vmatprep.subr.mxu1 %v1909_v32 }
  0xd0   : > { %v308_v15 = vsel %vm303_vm3, %v299_v11, %v279_v20  ;;  %v309_v17 = vsel %vm303_vm3, %v300_v16, %v281_v12  ;;  %v437_v18 = vsub.f32 %v2060_v3, %v436_v9  ;;  %v447_v19 = vsub.f32 %v2063_v5, %v446_v10  ;;  %1381 = vmatmul.mubr.f32.vlgmr.msra.gmra.mxu0 %v428_v14 }
  0xd1   : > { %v332_v41 = vsel %vm318_vm4, %v308_v15, 0  ;;  %v335_v21 = vsel %vm318_vm4, %v309_v17, 0  ;;  %1447 = vmatpush3.msra.mxu1 %v1909_v32  ;;  %1417 = vmatpush3.msra.mxu0 %v1915_v34 }
  0xd2   : > { %v2093_v25 = vand.u32 4294901760, %v332_v41  ;;  %v2095_v31 = vand.u32 4294901760, %v335_v21  ;;  %v438_v33 = vand.u32 4294901760, %v437_v18  ;;  %v448_v1 = vand.u32 4294901760, %v447_v19  ;;  %1448 = vmatprep.subr.mxu1 %v1923_v37  ;;  %1418 = vmatprep.subr.mxu0 %v1918_v35 }
  0xd3   : > { %v255_v13 = vpop.permute.xlu0 %254  ;;  %v257_v39 = vpop.permute.xlu1 %256  ;;  %1449 = vmatpush3.msra.mxu1 %v1923_v37  ;;  %1419 = vmatpush3.msra.mxu0 %v1918_v35 }
  0xd4   : > { %v2102_v49 = vsub.f32 %v332_v41, %v2093_v25  ;;  %v2105_v50 = vsub.f32 %v335_v21, %v2095_v31  ;;  %1383 = vmatprep.mubr.f32.mxu0 %v438_v33  ;;  %1410 = vmatprep.mubr.f32.mxu1 %v2093_v25  ;;  %v301_v4 = vsel %vm294_vm2, %v220_v51, %v255_v13 }
  0xd5   : > { %1384 = vmatmul.mubr.f32.gmra.mxu0 %v448_v1  ;;  %1411 = vmatmul.mubr.f32.gmra.mxu1 %v2095_v31  ;;  %v302_v7 = vsel %vm294_vm2, %v1955_v47, %v257_v39 }
  0xd6   : > { %v456_v34 = vand.u32 4294901760, %v2102_v49  ;;  %v466_v53 = vand.u32 4294901760, %v2105_v50  ;;  %1420 = vmatprep.subr.mxu0 %v1921_v36  ;;  %1450 = vmatprep.subr.mxu1 %v1946_v45 }
  0xd7   : > { %v283_v56 = vpop.permute.xlu0 %282  ;;  %v285_v58 = vpop.permute.xlu1 %284  ;;  %1421 = vmatpush3.msra.mxu0 %v1921_v36  ;;  %1451 = vmatpush3.msra.mxu1 %v1946_v45 }
  0xd8   : > { %v310_v24 = vsel %vm303_vm3, %v301_v4, %v283_v56  ;;  %v311_v30 = vsel %vm303_vm3, %v302_v7, %v285_v58  ;;  %v457_v22 = vsub.f32 %v2102_v49, %v456_v34  ;;  %v467_v35 = vsub.f32 %v2105_v50, %v466_v53  ;;  %1422 = vmatprep.subr.mxu0 %v1928_v40 }
  0xd9   : > { %v338_v61 = vsel %vm318_vm4, %v310_v24, 0  ;;  %v341_v47 = vsel %vm318_vm4, %v311_v30, 0  ;;  %1423 = vmatpush3.msra.mxu0 %v1928_v40  ;;  %1488 = vmatprep.subr.mxu1 %v1896_v26 }
  0xda   : > { %v2130_v0 = vand.u32 4294901760, %v338_v61  ;;  %v2132_v2 = vand.u32 4294901760, %v341_v47  ;;  %v458_v6 = vand.u32 4294901760, %v457_v22  ;;  %v468_v8 = vand.u32 4294901760, %v467_v35  ;;  %1424 = vmatprep.subr.mxu0 %v1949_v46 }
  0xdb   : > { %1425 = vmatpush3.msra.mxu0 %v1949_v46 }
  0xdc   : > { %v475_v36 = vsub.f32 %v338_v61, %v2130_v0  ;;  %v485_v11 = vsub.f32 %v341_v47, %v2132_v2  ;;  %1386 = vmatprep.mubr.f32.mxu0 %v458_v6  ;;  %1413 = vmatprep.mubr.f32.mxu1 %v2130_v0 }
  0xdd   : > { %1387 = vmatmul.mubr.f32.gmra.mxu0 %v468_v8  ;;  %1414 = vmatmul.mubr.f32.gmra.mxu1 %v2132_v2 }
  0xde   : > { %1452 = vmatprep.mubr.f32.mxu1 %v416_v28  ;;  %v476_v16 = vand.u32 4294901760, %v475_v36  ;;  %v486_v40 = vand.u32 4294901760, %v485_v11  ;;  %1426 = vmatprep.subr.mxu0 %v1971_v55 }
  0xdf   : > { %1427 = vmatpush3.msra.mxu0 %v1971_v55 }
  0xe0   : > { %v477_v20 = vsub.f32 %v475_v36, %v476_v16  ;;  %v487_v12 = vsub.f32 %v485_v11, %v486_v40  ;;  %1464 = vmatprep.subr.mxu0 %v1937_v42 }
  0xe1   : > { %1453 = vmatmul.mubr.f32.vlgmr.msra.gmra.mxu1 %v426_v63 }
  0xe2   : > { %1455 = vmatprep.mubr.f32.mxu1 %v436_v9  ;;  %v478_v14 = vand.u32 4294901760, %v477_v20  ;;  %v488_v28 = vand.u32 4294901760, %v487_v12  ;;  %1489 = vmatpush3.msra.mxu1 %v1896_v26 }
  0xe3   : > { %1490 = vmatprep.subr.mxu1 %v1898_v27 }
  0xe4   : > { %1389 = vmatprep.mubr.f32.mxu0 %v478_v14  ;;  %1491 = vmatpush3.msra.mxu1 %v1898_v27 }
  0xe5   : > { %1390 = vmatmul.mubr.f32.gmra.mxu0 %v488_v28  ;;  %1456 = vmatmul.mubr.f32.gmra.mxu1 %v446_v10 }
  0xe6   : > { %1428 = vmatprep.mubr.f32.mxu0 %v2025_v38  ;;  %1458 = vmatprep.mubr.f32.mxu1 %v456_v34 }
  0xe7   : > { %1492 = vmatprep.subr.mxu1 %v1905_v29 }
  0xe8   : > { %1493 = vmatpush3.msra.mxu1 %v1905_v29 }
  0xe9   : > { %1429 = vmatmul.mubr.f32.vlgmr.msra.gmra.mxu0 %v2041_v54  ;;  %1459 = vmatmul.mubr.f32.gmra.mxu1 %v466_v53 }
  0xea   : > { %1465 = vmatpush3.msra.mxu0 %v1937_v42  ;;  %1431 = vmatprep.mubr.f32.mxu0 %v2060_v3 }
  0xeb   : > { %1461 = vmatprep.mubr.f32.mxu1 %v476_v16  ;;  %1466 = vmatprep.subr.mxu0 %v1940_v43 }
  0xec   : > { %1494 = vmatprep.subr.mxu1 %v1909_v32  ;;  %1467 = vmatpush3.msra.mxu0 %v1940_v43 }
  0xed   : > { %1495 = vmatpush3.msra.mxu1 %v1909_v32  ;;  %1432 = vmatmul.mubr.f32.gmra.mxu0 %v2063_v5 }
  0xee   : > { %1462 = vmatmul.mubr.f32.gmra.mxu1 %v486_v40  ;;  %1496 = vmatprep.subr.mxu1 %v1923_v37 }
  0xef   : > { %1434 = vmatprep.mubr.f32.mxu0 %v2102_v49  ;;  %1468 = vmatprep.subr.mxu0 %v1943_v44 }
  0xf0   : > { %1497 = vmatpush3.msra.mxu1 %v1923_v37  ;;  %1500 = vmatprep.mubr.f32.mxu1 %v2020_v23 }
  0xf1   : > { %1469 = vmatpush3.msra.mxu0 %v1943_v44  ;;  %1498 = vmatprep.subr.mxu1 %v1946_v45 }
  0xf2   : > { %1470 = vmatprep.subr.mxu0 %v1965_v52  ;;  %1499 = vmatpush3.msra.mxu1 %v1946_v45 }
  0xf3   : > { %1435 = vmatmul.mubr.f32.gmra.mxu0 %v2105_v50  ;;  %1501 = vmatmul.mubr.f32.vlgmr.msra.gmra.mxu1 %v2034_v48 }
  0xf4   : > { %1471 = vmatpush3.msra.mxu0 %v1965_v52  ;;  %1437 = vmatprep.mubr.f32.mxu0 %v475_v36 }
  0xf5   : > { %1503 = vmatprep.mubr.f32.mxu1 %v2052_v59  ;;  %1472 = vmatprep.subr.mxu0 %v1975_v57 }
  0xf6   : > { %1473 = vmatpush3.msra.mxu0 %v1975_v57 }
  0xf7   : > { %1438 = vmatmul.mubr.f32.gmra.mxu0 %v485_v11  ;;  %1504 = vmatmul.mubr.f32.gmra.mxu1 %v2054_v60 }
  0xf8   : > { %1474 = vmatprep.subr.mxu0 %v1987_v62  ;;  %1476 = vmatprep.mubr.f32.mxu0 %v2020_v23 }
  0xf9   : > { %1506 = vmatprep.mubr.f32.mxu1 %v2093_v25  ;;  %1475 = vmatpush3.msra.mxu0 %v1987_v62 }
  0xfb   : > { %1477 = vmatmul.mubr.f32.vlgmr.msra.gmra.mxu0 %v2034_v48  ;;  %1507 = vmatmul.mubr.f32.gmra.mxu1 %v2095_v31 }
  0xfc   : > { %1479 = vmatprep.mubr.f32.mxu0 %v2052_v59  ;;  %1509 = vmatprep.mubr.f32.mxu1 %v2130_v0 }
  0xff   : > { %1480 = vmatmul.mubr.f32.gmra.mxu0 %v2054_v60  ;;  %1510 = vmatmul.mubr.f32.gmra.mxu1 %v2132_v2 }
 0x100   : > { %1482 = vmatprep.mubr.f32.mxu0 %v2093_v25 }
 0x103   : > { %1483 = vmatmul.mubr.f32.gmra.mxu0 %v2095_v31 }
 0x104   : > { %1485 = vmatprep.mubr.f32.mxu0 %v2130_v0 }
 0x107   : > { %1486 = vmatmul.mubr.f32.gmra.mxu0 %v2132_v2 }
 0x188   : > { %v1406_v26 = vpop.f32.mrf.mxu1 }
 0x18a   : > { %v591_v27 = vpop.f32.mrf.mxu1 }
 0x18d   : > { %v1409_v29 = vpop.f32.mrf.mxu1 }
 0x18f   : > { %v603_v37 = vpop.f32.mrf.mxu1 }
 0x190   : > { %v1382_v32 = vpop.f32.mrf.mxu0 }
 0x191   : > { %v598_v21 = vadd.f32 %v1406_v26, %v1382_v32 }
 0x192   : > { %v420_v42 = vpop.f32.mrf.mxu0 }
 0x193   : > { %v592_v33 = vadd.f32 %v591_v27, %v420_v42 }
 0x195   : > { %v1412_v43 = vpop.f32.mrf.mxu1  ;;  %v1385_v44 = vpop.f32.mrf.mxu0 }
 0x196   : > { %v610_v49 = vadd.f32 %v1409_v29, %v1385_v44 }
 0x197   : > { %v615_v45 = vpop.f32.mrf.mxu1  ;;  %v440_v46 = vpop.f32.mrf.mxu0 }
 0x198   : > { %v604_v34 = vadd.f32 %v603_v37, %v440_v46 }
 0x19d   : > { %v1415_v52 = vpop.f32.mrf.mxu1  ;;  %v1388_v55 = vpop.f32.mrf.mxu0 }
 0x19e   : > { %v622_v58 = vadd.f32 %v1412_v43, %v1388_v55 }
 0x19f   : > { %v627_v57 = vpop.f32.mrf.mxu1  ;;  %v460_v23 = vpop.f32.mrf.mxu0 }
 0x1a0   : > { %v616_v35 = vadd.f32 %v615_v45, %v460_v23 }
 0x1a1   : > { %v1454_v62 = vpop.f32.mrf.mxu1 }
 0x1a3   : > { %v845_v38 = vpop.f32.mrf.mxu1 }
 0x1a5   : > { %v1391_v48 = vpop.f32.mrf.mxu0  ;;  %v1457_v54 = vpop.f32.mrf.mxu1 }
 0x1a6   : > { %v634_v8 = vadd.f32 %v1415_v52, %v1391_v48 }
 0x1a7   : > { %v480_v59 = vpop.f32.mrf.mxu0  ;;  %v861_v60 = vpop.f32.mrf.mxu1 }
 0x1a8   : > { %v628_v14 = vadd.f32 %v627_v57, %v480_v59 }
 0x1a9   : > { %v1430_v63 = vpop.f32.mrf.mxu0  ;;  %v1460_v3 = vpop.f32.mrf.mxu1 }
 0x1aa   : > { %v725_v1 = vadd.f32 %v1430_v63, %v598_v21 }
 0x1ab   : > { %v717_v5 = vpop.f32.mrf.mxu0  ;;  %v877_v9 = vpop.f32.mrf.mxu1 }
 0x1ac   : > { %v718_v50 = vadd.f32 %v717_v5, %v592_v33  ;;  %v854_v4 = vadd.f32 %v1454_v62, %v725_v1 }
 0x1ad   : > { %v1433_v10 = vpop.f32.mrf.mxu0 }
 0x1ae   : > { %v1463_v15 = vpop.f32.mrf.mxu1  ;;  %v739_v53 = vadd.f32 %v1433_v10, %v610_v49  ;;  %v846_v22 = vadd.f32 %v845_v38, %v718_v50 }
 0x1af   : > { %v731_v17 = vpop.f32.mrf.mxu0 }
 0x1b0   : > { %v893_v18 = vpop.f32.mrf.mxu1  ;;  %v732_v24 = vadd.f32 %v731_v17, %v604_v34  ;;  %v870_v6 = vadd.f32 %v1457_v54, %v739_v53 }
 0x1b2   : > { %v862_v12 = vadd.f32 %v861_v60, %v732_v24 }
 0x1b3   : > { %v1436_v19 = vpop.f32.mrf.mxu0  ;;  %v1502_v41 = vpop.f32.mrf.mxu1 }
 0x1b4   : > { %v753_v47 = vadd.f32 %v1436_v19, %v622_v58 }
 0x1b5   : > { %v745_v25 = vpop.f32.mrf.mxu0  ;;  %v1109_v31 = vpop.f32.mrf.mxu1 }
 0x1b6   : > { %v746_v16 = vadd.f32 %v745_v25, %v616_v35  ;;  %v886_v32 = vadd.f32 %v1460_v3, %v753_v47 }
 0x1b7   : > { %v1439_v13 = vpop.f32.mrf.mxu0  ;;  %v1505_v39 = vpop.f32.mrf.mxu1 }
 0x1b8   : > { %v767_v26 = vadd.f32 %v1439_v13, %v634_v8  ;;  %v878_v46 = vadd.f32 %v877_v9, %v746_v16 }
 0x1b9   : > { %v759_v51 = vpop.f32.mrf.mxu0  ;;  %v1121_v7 = vpop.f32.mrf.mxu1 }
 0x1ba   : > { %v760_v43 = vadd.f32 %v759_v51, %v628_v14  ;;  %v902_v62 = vadd.f32 %v1463_v15, %v767_v26 }
 0x1bb   : > { %v1478_v56 = vpop.f32.mrf.mxu0  ;;  %v1508_v36 = vpop.f32.mrf.mxu1 }
 0x1bc   : > { %v997_v30 = vadd.f32 %v1478_v56, %v854_v4  ;;  %v894_v59 = vadd.f32 %v893_v18, %v760_v43 }
 0x1bd   : > { %v990_v61 = vpop.f32.mrf.mxu0  ;;  %v1133_v37 = vpop.f32.mrf.mxu1 }
 0x1be   : > { %v1116_v0 = vadd.f32 %v1502_v41, %v997_v30  ;;  %v991_v2 = vadd.f32 %v990_v61, %v846_v22 }
 0x1bf   : > { %v1481_v11 = vpop.f32.mrf.mxu0  ;;  %v1511_v23 = vpop.f32.mrf.mxu1 }
 0x1c0   : > { %1157 = vst.msk [vmem:[%s2199_s25 + $0x8] sm:$0xff] %vm1155_vm5, %v1116_v0  ;;  %v1110_v40 = vadd.f32 %v1109_v31, %v991_v2  ;;  %v1009_v20 = vadd.f32 %v1481_v11, %v870_v6 }
 0x1c1   : > { %v1002_v28 = vpop.f32.mrf.mxu0  ;;  %v1145_v5 = vpop.f32.mrf.mxu1 }
 0x1c2   : > { %1156 = vst.msk [vmem:[%s2199_s25] sm:$0xff] %vm1155_vm5, %v1110_v40  ;;  %v1128_v27 = vadd.f32 %v1505_v39, %v1009_v20  ;;  %v1003_v29 = vadd.f32 %v1002_v28, %v862_v12 }
 0x1c3   : > { %v1484_v42 = vpop.f32.mrf.mxu0 }
 0x1c4   : > { %1159 = vst.msk [vmem:[%s2199_s25 + $0x18] sm:$0xff] %vm1155_vm5, %v1128_v27  ;;  %v1122_v44 = vadd.f32 %v1121_v7, %v1003_v29  ;;  %v1021_v45 = vadd.f32 %v1484_v42, %v886_v32 }
 0x1c5   : > { %v1014_v52 = vpop.f32.mrf.mxu0 }
 0x1c6   : > { %1158 = vst.msk [vmem:[%s2199_s25 + $0x10] sm:$0xff] %vm1155_vm5, %v1122_v44  ;;  %v1140_v55 = vadd.f32 %v1508_v36, %v1021_v45  ;;  %v1015_v57 = vadd.f32 %v1014_v52, %v878_v46 }
 0x1c7   : > { %v1487_v38 = vpop.f32.mrf.mxu0 }
 0x1c8   : > { %1161 = vst.msk [vmem:[%s2199_s25 + $0x28] sm:$0xff] %vm1155_vm5, %v1140_v55  ;;  %v1134_v48 = vadd.f32 %v1133_v37, %v1015_v57  ;;  %v1033_v54 = vadd.f32 %v1487_v38, %v902_v62 }
 0x1c9   : > { %v1026_v60 = vpop.f32.mrf.mxu0 }
 0x1ca   : > { %1160 = vst.msk [vmem:[%s2199_s25 + $0x20] sm:$0xff] %vm1155_vm5, %v1134_v48  ;;  %v1152_v63 = vadd.f32 %v1511_v23, %v1033_v54  ;;  %v1027_v3 = vadd.f32 %v1026_v60, %v894_v59 }
 0x1cc   : > { %1163 = vst.msk [vmem:[%s2199_s25 + $0x38] sm:$0xff] %vm1155_vm5, %v1152_v63  ;;  %v1146_v9 = vadd.f32 %v1145_v5, %v1027_v3 }
 0x1ce   : > { %1162 = vst.msk [vmem:[%s2199_s25 + $0x30] sm:$0xff] %vm1155_vm5, %v1146_v9 }
 0x1cf   : > { %1642 = shalt.err (!%p1639_p0)
}
 0x1d0   : > { %s1643_s5 = scalar_lea.hbm %s2218_s24, 1024  ;;  %s1647_s22 = scalar_lea.hbm %s2269_s2, 2048 }
 0x1d1   : > { %p1644_p5 = scmp.ne.s32.totalorder %s2218_s24, %s1643_s5  ;;  %p1648_p4 = scmp.lt.s32.totalorder %s2218_s24, %s2269_s2 }
 0x1d2   : > { %p1649_p6 = scmp.lt.s32.totalorder %s1647_s22, %s1643_s5 }
 0x1d3   : > { %p1645_p2 = pnand %p1644_p5, %p2285_p11 }
 0x1d4   : > { %p1650_p8 = por %p1649_p6, %p1648_p4 }
 0x1d5   : > { %p1646_p1 = pneg %p1645_p2 }
 0x1d7   : > { %p1651_p3 = pnand %p1650_p8, %p1646_p1 }
 0x1d9   : > { %1654 = shalt.err (!%p1651_p3)
}
 0x1da   : > { %s1706_s17 = smov 128   ;;  %s1707_s15 = smov 8  }
 0x1db   : > { %1518 = dma.vmem_to_hbm [thread:$0]  (%p2285_p11), %s2220_s8, 1024, %s2218_s24, %s1165_s13, %s1706_s17, %s1706_s17, %s1707_s15  }
 0x1dc PF: > { %s1194_s25 = sand.u32 1, %s1685_s9   ;;  %p2286_p7 = scmp.ne.s32.totalorder %s2275_s16, 0 }
 0x1dd   : > { %p2287_p9 = scmp.ge.s32.totalorder %s1697_s12, 2  ;;  %s1195_s26 = scalar_lea.sflag [#allocation4], %s1194_s25 }
 0x1df   : > { %p1529_p10 = pnand %p2287_p9, %p2286_p7 }
 0x1e1   : > { %p1530_p12 = pneg %p1529_p10 }
 0x1e3   : > { %1680 = dma.done.wait (%p1530_p12), %s1195_s26, 1024  }
 0x1e4   : > { %1682 = vsyncadd (%p1530_p12), %s1195_s26, 4294966272  ;;  %p16_p13 = scmp.ge.s32.totalorder %s1777_s21, 4   ;;  %s2288_s9 = smov %s1689_s10 }
 0x1e5   : > { %s2289_s10 = smov %s1693_s11  ;;  %s2290_s11 = smov %s1797_s29 }
 0x1e6   : > { %s2291_s12 = smov %s1777_s21  ;;  %18 = sbr.rel (!%p16_p13) target bundleno = 6 (0x6), region = 77 }
 0x1eb   :  { %1200 = vsyncpa [#allocation3], 1 }
 0x1ec   :  { %1202 = vsyncpa [#allocation3 + $0x1], 1 }
 0x1ed   :  { %1203 = vsyncpa [#allocation6], 1 }
 0x1ee   :  { %1204 = vsyncpa [#allocation4], 1 }
 0x1ef   :  { %1206 = vsyncpa [#allocation4 + $0x1], 1 }

</bundles_post_ra>
